<compile_context>
chip_gen: v7x
topology: tpu7x:2x2x1
jax: 0.10.0
libtpu: 0.0.40
codegen_flags: <defaults>
</compile_context>

<pallas_src>
import functools

import jax
import jax.numpy as jnp
from jax.experimental import pallas as pl
from jax.experimental.pallas import tpu as pltpu


def _round_up(x, m):
    return (x + m - 1) // m * m


def _ffn_kernel(x_ref, w1_ref, b1_ref, w2_ref, b2_ref, o_ref, acc_ref):
    """One (row tile i, hidden tile j) step of out = relu(x@W1 + b1)@W2 + b2.

    x_ref:  (tm, E_pad)      w1_ref: (E_pad, tf)   b1_ref: (1, tf)   [f32]
    w2_ref: (tf, E_pad)      b2_ref: (1, E_pad)    [f32]
    o_ref:  (tm, E_pad)      acc_ref: (tm, E_pad)  f32 VMEM scratch
    """
    j = pl.program_id(1)

    @pl.when(j == 0)
    def _init():
        acc_ref[...] = jnp.zeros_like(acc_ref)

    # h_j = relu(x_i @ W1[:, j*tf:(j+1)*tf] + b1[j])  -- f32 MXU accumulation
    h = jnp.dot(x_ref[...], w1_ref[...], preferred_element_type=jnp.float32)
    h = jnp.maximum(h + b1_ref[...], 0.0)

    # acc += h_j @ W2[j*tf:(j+1)*tf, :]  (h cast back to the compute dtype)
    acc_ref[...] += jnp.dot(h.astype(w2_ref.dtype), w2_ref[...],
                            preferred_element_type=jnp.float32)

    @pl.when(j == pl.num_programs(1) - 1)
    def _finalize():
        o_ref[...] = (acc_ref[...] + b2_ref[...]).astype(o_ref.dtype)


@functools.partial(jax.jit,
                   static_argnames=("block_rows", "block_ff", "compute_dtype"))
def feed_forward(x, w1, b1, w2, b2, *,
                 block_rows=256, block_ff=512, compute_dtype=None):
    """x: [B, S, E] -> [B, S, E]; w1: [E, F], b1: [F], w2: [F, E], b2: [E].

    compute_dtype: dtype used for the MXU matmul operands (e.g. jnp.bfloat16).
    Accumulation is always f32; output keeps x.dtype.
    """
    B, S, E = x.shape
    F = w1.shape[1]
    N = B * S
    out_dtype = x.dtype
    cd = jnp.dtype(out_dtype if compute_dtype is None else compute_dtype)

    # Tile sizes: rows multiple of 8 (f32) / 16 (bf16); lane dims multiple of 128.
    row_mult = max(8, 32 // cd.itemsize)
    tm = min(_round_up(block_rows, row_mult), _round_up(N, row_mult))
    tf = min(_round_up(block_ff, 128), _round_up(F, 128))

    N_pad = _round_up(N, tm)
    E_pad = _round_up(E, 128)
    F_pad = _round_up(F, tf)

    # Pad + cast in the wrapper (zero padding is exact for this op: padded
    # hidden units contribute 0 through relu and W2's zero rows).
    x2d = jnp.pad(x.reshape(N, E).astype(cd), ((0, N_pad - N), (0, E_pad - E)))
    w1p = jnp.pad(w1.astype(cd), ((0, E_pad - E), (0, F_pad - F)))
    w2p = jnp.pad(w2.astype(cd), ((0, F_pad - F), (0, E_pad - E)))
    b1p = jnp.pad(b1.astype(jnp.float32), (0, F_pad - F)).reshape(1, F_pad)
    b2p = jnp.pad(b2.astype(jnp.float32), (0, E_pad - E)).reshape(1, E_pad)

    grid = (N_pad // tm, F_pad // tf)

    # Explicit VMEM budget (double-buffered tiles + f32 accumulator) with headroom.
    isz = cd.itemsize
    osz = jnp.dtype(out_dtype).itemsize
    vmem_bytes = (2 * tm * E_pad * isz          # x tiles
                  + 2 * E_pad * tf * isz        # W1 tiles
                  + 2 * tf * E_pad * isz        # W2 tiles
                  + 2 * (tf + E_pad) * 4        # bias tiles
                  + 2 * tm * E_pad * osz        # out tiles
                  + tm * E_pad * 4)             # f32 accumulator scratch
    vmem_limit = min(max(32 * 1024 * 1024, (vmem_bytes * 3) // 2),
                     128 * 1024 * 1024)

    flops = 4 * N_pad * E_pad * F_pad  # two matmuls
    bytes_accessed = (N_pad * E_pad * isz                      # x read
                      + grid[0] * (E_pad * F_pad * isz) * 2    # W1 + W2 per row tile
                      + (F_pad + E_pad) * 4
                      + N_pad * E_pad * osz)                   # out write

    out2d = pl.pallas_call(
        _ffn_kernel,
        out_shape=jax.ShapeDtypeStruct((N_pad, E_pad), out_dtype),
        grid_spec=pltpu.PrefetchScalarGridSpec(
            num_scalar_prefetch=0,
            grid=grid,
            in_specs=[
                pl.BlockSpec((tm, E_pad), lambda i, j: (i, 0)),   # x row tile
                pl.BlockSpec((E_pad, tf), lambda i, j: (0, j)),   # W1 F-tile
                pl.BlockSpec((1, tf),     lambda i, j: (0, j)),   # b1 F-tile
                pl.BlockSpec((tf, E_pad), lambda i, j: (j, 0)),   # W2 F-tile
                pl.BlockSpec((1, E_pad),  lambda i, j: (0, 0)),   # b2
            ],
            out_specs=pl.BlockSpec((tm, E_pad), lambda i, j: (i, 0)),
            scratch_shapes=[pltpu.VMEM((tm, E_pad), jnp.float32)],
        ),
        compiler_params=pltpu.CompilerParams(
            dimension_semantics=("parallel", "arbitrary"),
            vmem_limit_bytes=int(vmem_limit)),
        cost_estimate=pl.CostEstimate(
            flops=int(flops), transcendentals=0,
            bytes_accessed=int(bytes_accessed)),
    )(x2d, w1p, b1p, w2p, b2p)

    return out2d[:N, :E].reshape(B, S, E)


def _torch_like_linear_init(key, fan_in, fan_out, dtype=jnp.float32):
    """Deterministic init mimicking nn.Linear's U(-1/sqrt(fan_in), 1/sqrt(fan_in))."""
    kw, kb = jax.random.split(key)
    bound = 1.0 / (fan_in ** 0.5)
    # stored as [in, out] (transpose of torch's [out, in]) for row-major matmul
    w = jax.random.uniform(kw, (fan_in, fan_out), dtype, minval=-bound, maxval=bound)
    b = jax.random.uniform(kb, (fan_out,), dtype, minval=-bound, maxval=bound)
    return w, b


if __name__ == "__main__":
    key = jax.random.PRNGKey(0)
    k_x, k_l1, k_l2 = jax.random.split(key, 3)

    # small shapes consistent with the module's forward
    B, S, E, FF = 2, 8, 32, 64

    x = jax.random.normal(k_x, (B, S, E), dtype=jnp.float32)
    w1, b1 = _torch_like_linear_init(k_l1, E, FF)   # Linear(embed_dim, ff_dim)
    w2, b2 = _torch_like_linear_init(k_l2, FF, E)   # Linear(ff_dim, embed_dim)

    # plain-JAX reference (eval-mode dropout = identity)
    ref = (jnp.maximum(x.reshape(-1, E) @ w1 + b1, 0.0) @ w2 + b2).reshape(B, S, E)

    # f32 compute path (tight tolerance)
    out = feed_forward(x, w1, b1, w2, b2)
    out = jax.block_until_ready(out)
    assert jnp.allclose(out, ref, atol=1e-5, rtol=1e-5), "f32 mismatch vs reference"

    # bf16 MXU path (f32 accumulation) — looser tolerance
    out_bf16 = feed_forward(x, w1, b1, w2, b2, compute_dtype=jnp.bfloat16)
    out_bf16 = jax.block_until_ready(out_bf16)
    assert jnp.allclose(out_bf16, ref, atol=5e-2, rtol=5e-2), "bf16 mismatch vs reference"

    print("KERNEL_OK")
</pallas_src>

<mosaic_0001>
module attributes {stable_mosaic.version = 11 : i64} {
  func.func @_ffn_kernel(%arg0: i32, %arg1: i32, %arg2: memref<16x128xf32, #tpu.memory_space<vmem>>, %arg3: memref<128x128xf32, #tpu.memory_space<vmem>>, %arg4: memref<1x128xf32, #tpu.memory_space<vmem>>, %arg5: memref<128x128xf32, #tpu.memory_space<vmem>>, %arg6: memref<1x128xf32, #tpu.memory_space<vmem>>, %arg7: memref<16x128xf32, #tpu.memory_space<vmem>>, %arg8: memref<16x128xf32, #tpu.memory_space<vmem>>) attributes {dimension_semantics = [#tpu.dimension_semantics<parallel>, #tpu.dimension_semantics<arbitrary>], iteration_bounds = array<i64: 1, 1>, scalar_prefetch = 0 : i64, scratch_operands = 1 : i64, tpu.core_type = #tpu.core_type<tc>, window_params = [{transform_indices = @transform_0, window_bounds = array<i64: 16, 128>}, {transform_indices = @transform_1, window_bounds = array<i64: 128, 128>}, {transform_indices = @transform_2, window_bounds = array<i64: 1, 128>}, {transform_indices = @transform_3, window_bounds = array<i64: 128, 128>}, {pipeline_mode = #tpu.pipeline_mode<synchronous>, transform_indices = @transform_4, window_bounds = array<i64: 1, 128>}, {transform_indices = @transform_5, window_bounds = array<i64: 16, 128>}]} {
    %c0_i32 = arith.constant 0 : i32
    %0 = arith.cmpi eq, %arg1, %c0_i32 : i32
    %1 = arith.extui %0 : i1 to i32
    %c0_i32_0 = arith.constant 0 : i32
    %2 = arith.cmpi ne, %1, %c0_i32_0 : i32
    scf.if %2 {
      %cst_16 = arith.constant 0.000000e+00 : f32
      %19 = vector.broadcast %cst_16 : f32 to vector<16x128xf32>
      %c0_17 = arith.constant 0 : index
      %c0_18 = arith.constant 0 : index
      %20 = vector.load %arg8[%c0_17, %c0_18] : memref<16x128xf32, #tpu.memory_space<vmem>>, vector<16x128xf32>
      tpu.vector_store %arg8[%c0_17, %c0_18], %19 {strides = array<i32>} : memref<16x128xf32, #tpu.memory_space<vmem>>, vector<16x128xf32>,
    } else {
    }
    %c0 = arith.constant 0 : index
    %c0_1 = arith.constant 0 : index
    %3 = vector.load %arg2[%c0, %c0_1] : memref<16x128xf32, #tpu.memory_space<vmem>>, vector<16x128xf32>
    %c0_2 = arith.constant 0 : index
    %c0_3 = arith.constant 0 : index
    %4 = vector.load %arg3[%c0_2, %c0_3] : memref<128x128xf32, #tpu.memory_space<vmem>>, vector<128x128xf32>
    %cst = arith.constant dense<0.000000e+00> : vector<16x128xf32>
    %5 = tpu.matmul %3, %4, %cst {dimension_numbers = #tpu.dot_dimension_numbers<[1], [0], [0], [1], [0, 0, 1, 1], [], []>} : vector<16x128xf32>, vector<128x128xf32>, vector<16x128xf32> -> vector<16x128xf32>
    %c0_4 = arith.constant 0 : index
    %c0_5 = arith.constant 0 : index
    %6 = vector.load %arg4[%c0_4, %c0_5] : memref<1x128xf32, #tpu.memory_space<vmem>>, vector<1x128xf32>
    %7 = vector.broadcast %6 : vector<1x128xf32> to vector<16x128xf32>
    %8 = arith.addf %5, %7 : vector<16x128xf32>
    %cst_6 = arith.constant 0.000000e+00 : f32
    %9 = vector.broadcast %cst_6 : f32 to vector<16x128xf32>
    %10 = arith.maximumf %8, %9 : vector<16x128xf32>
    %c0_7 = arith.constant 0 : index
    %c0_8 = arith.constant 0 : index
    %11 = vector.load %arg8[%c0_7, %c0_8] : memref<16x128xf32, #tpu.memory_space<vmem>>, vector<16x128xf32>
    %c0_9 = arith.constant 0 : index
    %c0_10 = arith.constant 0 : index
    %12 = vector.load %arg5[%c0_9, %c0_10] : memref<128x128xf32, #tpu.memory_space<vmem>>, vector<128x128xf32>
    %cst_11 = arith.constant dense<0.000000e+00> : vector<16x128xf32>
    %13 = tpu.matmul %10, %12, %cst_11 {dimension_numbers = #tpu.dot_dimension_numbers<[1], [0], [0], [1], [0, 0, 1, 1], [], []>} : vector<16x128xf32>, vector<128x128xf32>, vector<16x128xf32> -> vector<16x128xf32>
    %14 = arith.addf %11, %13 : vector<16x128xf32>
    %c0_12 = arith.constant 0 : index
    %c0_13 = arith.constant 0 : index
    %15 = vector.load %arg8[%c0_12, %c0_13] : memref<16x128xf32, #tpu.memory_space<vmem>>, vector<16x128xf32>
    tpu.vector_store %arg8[%c0_12, %c0_13], %14 {strides = array<i32>} : memref<16x128xf32, #tpu.memory_space<vmem>>, vector<16x128xf32>,
    %c0_i32_14 = arith.constant 0 : i32
    %16 = arith.cmpi eq, %arg1, %c0_i32_14 : i32
    %17 = arith.extui %16 : i1 to i32
    %c0_i32_15 = arith.constant 0 : i32
    %18 = arith.cmpi ne, %17, %c0_i32_15 : i32
    scf.if %18 {
      %c0_16 = arith.constant 0 : index
      %c0_17 = arith.constant 0 : index
      %19 = vector.load %arg8[%c0_16, %c0_17] : memref<16x128xf32, #tpu.memory_space<vmem>>, vector<16x128xf32>
      %c0_18 = arith.constant 0 : index
      %c0_19 = arith.constant 0 : index
      %20 = vector.load %arg6[%c0_18, %c0_19] : memref<1x128xf32, #tpu.memory_space<vmem>>, vector<1x128xf32>
      %21 = vector.broadcast %20 : vector<1x128xf32> to vector<16x128xf32>
      %22 = arith.addf %19, %21 : vector<16x128xf32>
      %c0_20 = arith.constant 0 : index
      %c0_21 = arith.constant 0 : index
      %23 = vector.load %arg7[%c0_20, %c0_21] : memref<16x128xf32, #tpu.memory_space<vmem>>, vector<16x128xf32>
      tpu.vector_store %arg7[%c0_20, %c0_21], %22 {strides = array<i32>} : memref<16x128xf32, #tpu.memory_space<vmem>>, vector<16x128xf32>,
    } else {
    }
    return
  }
  func.func @transform_0(%arg0: i32, %arg1: i32) -> (i32, i32) {
    %c0_i32 = arith.constant 0 : i32
    %c0_i32_0 = arith.constant 0 : i32
    return %arg0, %c0_i32 : i32, i32
  }
  func.func @transform_1(%arg0: i32, %arg1: i32) -> (i32, i32) {
    %c0_i32 = arith.constant 0 : i32
    %c0_i32_0 = arith.constant 0 : i32
    return %c0_i32, %arg1 : i32, i32
  }
  func.func @transform_2(%arg0: i32, %arg1: i32) -> (i32, i32) {
    %c0_i32 = arith.constant 0 : i32
    %c0_i32_0 = arith.constant 0 : i32
    return %c0_i32, %arg1 : i32, i32
  }
  func.func @transform_3(%arg0: i32, %arg1: i32) -> (i32, i32) {
    %c0_i32 = arith.constant 0 : i32
    %c0_i32_0 = arith.constant 0 : i32
    return %arg1, %c0_i32 : i32, i32
  }
  func.func @transform_4(%arg0: i32, %arg1: i32) -> (i32, i32) {
    %c0_i32 = arith.constant 0 : i32
    %c0_i32_0 = arith.constant 0 : i32
    %c0_i32_1 = arith.constant 0 : i32
    return %c0_i32, %c0_i32_0 : i32, i32
  }
  func.func @transform_5(%arg0: i32, %arg1: i32) -> (i32, i32) {
    %c0_i32 = arith.constant 0 : i32
    %c0_i32_0 = arith.constant 0 : i32
    return %arg0, %c0_i32 : i32, i32
  }
}

</mosaic_0001>

<bundles_post_ra>
// kernel: feed_forward.1
= control target key start
LH: loop header
LB: loop body
LE: loop exit
PB: predicated region body
PF: predicated region fallthrough
CT: control target
= control target key end

     0   :  { %s561_s1 = inlined_call_operand.vmem [shape: f32[128,128], index: 1, kind: input, shape index: {}]   ;;  %s562_s0 = inlined_call_operand.vmem [shape: f32[16,128], index: 0, kind: input, shape index: {}]   ;;  %s563_s3 = inlined_call_operand.vmem [shape: f32[128,128], index: 3, kind: input, shape index: {}]   ;;  %s564_s2 = inlined_call_operand.vmem [shape: f32[1,128], index: 2, kind: input, shape index: {}]   ;;  %s565_s4 = inlined_call_operand.vmem [shape: f32[1,128], index: 4, kind: input, shape index: {}]   ;;  %s566_s5 = inlined_call_operand.vmem [shape: f32[16,128], index: 5, kind: output, shape index: {}]  }
   0x1   :  { %v28_v0 = vld [vmem:[%s561_s1] sm:$0xff]  ;;  %v29_v1 = vld [vmem:[%s561_s1 + $0x8] sm:$0xff]  ;;  %v30_v2 = vld [vmem:[%s561_s1 + $0x10] sm:$0xff] }
   0x2   :  { %v353_v3 = vpack.c.bf16 %v29_v1, %v28_v0  ;;  %v31_v4 = vld [vmem:[%s561_s1 + $0x18] sm:$0xff]  ;;  %v32_v6 = vld [vmem:[%s561_s1 + $0x20] sm:$0xff]  ;;  %v33_v7 = vld [vmem:[%s561_s1 + $0x28] sm:$0xff] }
   0x3   :  { %v357_v5 = vpack.c.bf16 %v31_v4, %v30_v2  ;;  %v361_v8 = vpack.c.bf16 %v33_v7, %v32_v6  ;;  %v34_v9 = vld [vmem:[%s561_s1 + $0x30] sm:$0xff]  ;;  %v35_v10 = vld [vmem:[%s561_s1 + $0x38] sm:$0xff]  ;;  %v26_v11 = vld [vmem:[%s562_s0] sm:$0xff] }
   0x4   :  { %354 = vmatprep.subr.bf16.mxu0 %v353_v3  ;;  %315 = vmatprep.mubr.f32.mxu0 %v26_v11  ;;  %v130_v12 = vld [vmem:[%s563_s3] sm:$0xff]  ;;  %v131_v13 = vld [vmem:[%s563_s3 + $0x8] sm:$0xff]  ;;  %v132_v14 = vld [vmem:[%s563_s3 + $0x10] sm:$0xff]  ;;  %v365_v20 = vpack.c.bf16 %v35_v10, %v34_v9 }
   0x5   :  { %356 = vmatpush3.bf16.msra.mxu0 %v353_v3  ;;  %v385_v15 = vpack.c.bf16 %v131_v13, %v130_v12  ;;  %v133_v16 = vld [vmem:[%s563_s3 + $0x18] sm:$0xff]  ;;  %v134_v18 = vld [vmem:[%s563_s3 + $0x20] sm:$0xff]  ;;  %v135_v19 = vld [vmem:[%s563_s3 + $0x28] sm:$0xff] }
   0x6   :  { %358 = vmatprep.subr.bf16.mxu0 %v357_v5  ;;  %v389_v17 = vpack.c.bf16 %v133_v16, %v132_v14  ;;  %v36_v21 = vld [vmem:[%s561_s1 + $0x40] sm:$0xff]  ;;  %v37_v22 = vld [vmem:[%s561_s1 + $0x48] sm:$0xff]  ;;  %v393_v23 = vpack.c.bf16 %v135_v19, %v134_v18  ;;  %v136_v24 = vld [vmem:[%s563_s3 + $0x30] sm:$0xff] }
   0x7   :  { %386 = vmatprep.subr.bf16.mxu1 %v385_v15  ;;  %v137_v25 = vld [vmem:[%s563_s3 + $0x38] sm:$0xff]  ;;  %v369_v26 = vpack.c.bf16 %v37_v22, %v36_v21  ;;  %v38_v27 = vld [vmem:[%s561_s1 + $0x50] sm:$0xff]  ;;  %v138_v30 = vld [vmem:[%s563_s3 + $0x40] sm:$0xff] }
   0x8   :  { %388 = vmatpush3.bf16.msra.mxu1 %v385_v15  ;;  %v39_v28 = vld [vmem:[%s561_s1 + $0x58] sm:$0xff]  ;;  %v397_v29 = vpack.c.bf16 %v137_v25, %v136_v24  ;;  %v139_v31 = vld [vmem:[%s563_s3 + $0x48] sm:$0xff]  ;;  %v40_v33 = vld [vmem:[%s561_s1 + $0x60] sm:$0xff] }
   0x9   :  { %360 = vmatpush3.bf16.msra.mxu0 %v357_v5  ;;  %390 = vmatprep.subr.bf16.mxu1 %v389_v17  ;;  %v373_v32 = vpack.c.bf16 %v39_v28, %v38_v27  ;;  %v41_v34 = vld [vmem:[%s561_s1 + $0x68] sm:$0xff]  ;;  %v401_v35 = vpack.c.bf16 %v139_v31, %v138_v30  ;;  %v140_v36 = vld [vmem:[%s563_s3 + $0x50] sm:$0xff]  ;;  %v141_v37 = vld [vmem:[%s563_s3 + $0x58] sm:$0xff] }
   0xa   :  { %362 = vmatprep.subr.bf16.mxu0 %v361_v8  ;;  %v377_v38 = vpack.c.bf16 %v41_v34, %v40_v33  ;;  %v42_v39 = vld [vmem:[%s561_s1 + $0x70] sm:$0xff]  ;;  %v43_v40 = vld [vmem:[%s561_s1 + $0x78] sm:$0xff]  ;;  %v405_v41 = vpack.c.bf16 %v141_v37, %v140_v36  ;;  %v142_v42 = vld [vmem:[%s563_s3 + $0x60] sm:$0xff] }
   0xb   :  { %v143_v43 = vld [vmem:[%s563_s3 + $0x68] sm:$0xff]  ;;  %v381_v44 = vpack.c.bf16 %v43_v40, %v42_v39  ;;  %v144_v47 = vld [vmem:[%s563_s3 + $0x70] sm:$0xff]  ;;  %v145_v48 = vld [vmem:[%s563_s3 + $0x78] sm:$0xff] }
   0xc   :  { %392 = vmatpush3.bf16.msra.mxu1 %v389_v17  ;;  %v409_v45 = vpack.c.bf16 %v143_v43, %v142_v42  ;;  %v27_v46 = vld [vmem:[%s562_s0 + $0x8] sm:$0xff]  ;;  %v413_v49 = vpack.c.bf16 %v145_v48, %v144_v47  ;;  %v245_v50 = vld [vmem:[%s564_s2] ss:$0 sm:$0xff] }
   0xd   :  { %364 = vmatpush3.bf16.msra.mxu0 %v361_v8  ;;  %394 = vmatprep.subr.bf16.mxu1 %v393_v23  ;;  %v246_v57 = vld [vmem:[%s565_s4] ss:$0 sm:$0xff] }
   0xe   :  { %366 = vmatprep.subr.bf16.mxu0 %v365_v20 }
  0x10   :  { %396 = vmatpush3.bf16.msra.mxu1 %v393_v23 }
  0x11   :  { %368 = vmatpush3.bf16.msra.mxu0 %v365_v20  ;;  %398 = vmatprep.subr.bf16.mxu1 %v397_v29 }
  0x12   :  { %370 = vmatprep.subr.bf16.mxu0 %v369_v26 }
  0x14   :  { %400 = vmatpush3.bf16.msra.mxu1 %v397_v29 }
  0x15   :  { %372 = vmatpush3.bf16.msra.mxu0 %v369_v26  ;;  %402 = vmatprep.subr.bf16.mxu1 %v401_v35 }
  0x16   :  { %374 = vmatprep.subr.bf16.mxu0 %v373_v32 }
  0x18   :  { %404 = vmatpush3.bf16.msra.mxu1 %v401_v35 }
  0x19   :  { %376 = vmatpush3.bf16.msra.mxu0 %v373_v32  ;;  %406 = vmatprep.subr.bf16.mxu1 %v405_v41 }
  0x1a   :  { %378 = vmatprep.subr.bf16.mxu0 %v377_v38 }
  0x1c   :  { %408 = vmatpush3.bf16.msra.mxu1 %v405_v41 }
  0x1d   :  { %380 = vmatpush3.bf16.msra.mxu0 %v377_v38  ;;  %410 = vmatprep.subr.bf16.mxu1 %v409_v45 }
  0x1e   :  { %382 = vmatprep.subr.bf16.mxu0 %v381_v44 }
  0x20   :  { %412 = vmatpush3.bf16.msra.mxu1 %v409_v45 }
  0x21   :  { %384 = vmatpush3.bf16.msra.mxu0 %v381_v44  ;;  %414 = vmatprep.subr.bf16.mxu1 %v413_v49 }
  0x24   :  { %316 = vmatmul.mubr.f32.vlgmr.msra.gmra.mrb[0].mxu0 %v27_v46  ;;  %416 = vmatpush3.bf16.msra.mxu1 %v413_v49 }
  0xf7   :  { %v317_v51 = vpop.f32.mrb[0].mxu0 }
  0xf8   :  { %v123_v52 = vadd.f32 %v317_v51, %v245_v50  ;;  %v117_v53 = vpop.f32.mrb[1].mxu0 }
  0xf9   :  { %v118_v54 = vadd.f32 %v245_v50, %v117_v53 }
  0xfa   :  { %v127_v56 = vmax.f32 %v123_v52, 0.0 }
  0xfb   :  { %v126_v55 = vmax.f32 %v118_v54, 0.0 }
  0xfd   :  { %350 = vmatprep.mubr.f32.mxu1 %v126_v55 }
  0xfe   :  { %351 = vmatmul.mubr.f32.vlgmr.msra.gmra.mrb[0].mxu1 %v127_v56 }
 0x1d1   :  { %v352_v58 = vpop.f32.mrb[0].mxu1 }
 0x1d2   :  { %v238_v59 = vadd.f32 %v352_v58, %v246_v57  ;;  %v212_v60 = vpop.f32.mrb[1].mxu1 }
 0x1d3   :  { %v237_v61 = vadd.f32 %v246_v57, %v212_v60 }
 0x1d4   :  { %240 = vst [vmem:[%s566_s5 + $0x8] sm:$0xff] %v238_v59 }
 0x1d5   :  { %239 = vst [vmem:[%s566_s5] sm:$0xff] %v237_v61 }

</bundles_post_ra>
